<compile_context>
chip_gen: v5e
topology: v5e:2x2
jax: 0.10.0
libtpu: 0.0.40
codegen_flags: <defaults>
</compile_context>

<pallas_src>
import jax
import jax.numpy as jnp
from jax.experimental import pallas as pl
from jax.experimental.pallas import tpu as pltpu


def _discriminator_kernel(z_ref, w1_ref, b1_ref, w2_ref, b2_ref, w3_ref, b3_ref,
                          out_ref):
    # fc1 (MXU: bf16 in, f32 accumulate) + dropout(eval == identity) + relu.
    # z arrives as f32 straight from HBM; the bf16 cast happens here (cheap VPU
    # op) instead of a separate XLA pad/cast pre-pass on the host side.
    z = z_ref[...].astype(jnp.bfloat16)
    h = jnp.dot(z, w1_ref[...], preferred_element_type=jnp.float32)
    h = jnp.maximum(h + b1_ref[...], 0.0)

    # fc2 (MXU: bf16 in, f32 accumulate) + dropout(eval == identity) + relu.
    # Bias add / ReLU stay f32 (v5e VPU has no bf16 support).
    h = jnp.dot(h.astype(jnp.bfloat16), w2_ref[...],
                preferred_element_type=jnp.float32)
    h = jnp.maximum(h + b2_ref[...], 0.0)

    # fc3 (hidden -> 1) on the VPU/XLU: elementwise multiply by the (1, hidden)
    # weight row and reduce over lanes; skips a wasteful N=1 MXU push/pop and a
    # masked (tb, 1) store.  The lane reduce / (tb,)->(1,tb) move runs on the
    # otherwise-idle XLU slot.
    logits = jnp.sum(h * w3_ref[...], axis=-1) + b3_ref[0, 0]        # (tb,)
    prob = jax.nn.sigmoid(logits)

    # Lane-dense store: one (1, tb) row per grid step.
    out_ref[...] = prob[None, :].astype(out_ref.dtype)
    # TODO(synk): training-mode dropout (p=0.2) would need pltpu.prng_seed /
    # pltpu.prng_random_bits + 1/(1-p) scaling; only eval semantics here.


def _round_up(x, m):
    return (x + m - 1) // m * m


def _device_vmem_bytes(default=64 * 1024 * 1024):
    """Physical VMEM per TensorCore; conservative (v7x) fallback if query fails."""
    try:
        info = pltpu.get_tpu_info()
        cap = getattr(info, "vmem_capacity_bytes", None)
        if cap:
            return int(cap)
    except Exception:
        pass
    return default


def discriminator_forward(z, params, *, block_batch=1024):
    """z: (B, inp) float32. params: dict of w1,b1,w2,b2,w3,b3 (w's transposed).

    Returns (B, 1) float32 probabilities.

    NOTE: for B <= ~64 the whole workload is a few KB and wall-clock is
    dominated by dispatch / pipeline prologue, so letting XLA fuse the 3-layer
    MLP is equally fast; the Pallas path is used unconditionally here so it
    stays exercised and correct.
    """
    B, inp = z.shape
    hidden = params["w1"].shape[1]

    # Batch tiling: aim for >= 2 grid steps (feeds both TensorCores on v7x),
    # tiles are multiples of 8 sublanes, capped at block_batch rows to amortize
    # the ~0.35 us per-step pipeline overhead.  No host-side padding: the
    # ragged tail tile reads unspecified rows, which are discarded below.
    tb = min(block_batch, max(_round_up(pl.cdiv(B, 2), 8), 8))
    num_tiles = pl.cdiv(B, tb)

    # bf16 weights for the MXU layers; biases / fc3 weights in f32.
    w1 = params["w1"].astype(jnp.bfloat16)
    w2 = params["w2"].astype(jnp.bfloat16)
    b1 = params["b1"].astype(jnp.float32).reshape(1, hidden)
    b2 = params["b2"].astype(jnp.float32).reshape(1, hidden)
    w3_row = params["w3"].astype(jnp.float32).reshape(1, hidden)
    b3 = params["b3"].astype(jnp.float32).reshape(1, 1)

    # Resident operands: block index never changes -> single DMA, reused in
    # VMEM across every grid step.
    resident = lambda shape: pl.BlockSpec(shape, lambda i: (0,) * len(shape))

    # VMEM budget: double-buffered z tile + (double-buffered) resident weights
    # + output rows + f32 intermediates, clamped to the physical VMEM of the
    # current generation (64 MiB/TC on v7x, 128 MiB on v5e/v6e).
    needed = (2 * tb * inp * 4                      # z tile (f32, double-buffered)
              + 2 * (w1.size + w2.size) * 2         # bf16 weights
              + 2 * (b1.size + b2.size + w3_row.size) * 4
              + 2 * tb * 4                          # output row
              + 4 * tb * hidden * 4)                # f32 intermediates headroom
    vmem_limit = int(min(max(needed + (8 << 20), 32 << 20), _device_vmem_bytes()))
    # TODO(synk): for hidden >= ~4096, w2 (hidden^2 bf16, double-buffered) no
    # longer fits v7x's 64 MiB VMEM; that regime needs a K-tiled ("arbitrary")
    # grid axis for fc2 with an f32 accumulator.

    rows = num_tiles * tb
    flops = 2 * rows * (inp * hidden + hidden * hidden + hidden)
    bytes_accessed = (B * inp * 4 + w1.size * 2 + w2.size * 2
                      + (b1.size + b2.size + w3_row.size + b3.size) * 4
                      + rows * 4)
    cost = pl.CostEstimate(flops=flops, transcendentals=rows,
                           bytes_accessed=bytes_accessed)

    out = pl.pallas_call(
        _discriminator_kernel,
        out_shape=jax.ShapeDtypeStruct((num_tiles, tb), jnp.float32),
        grid=(num_tiles,),
        in_specs=[
            pl.BlockSpec((tb, inp), lambda i: (i, 0)),            # z batch tile (f32)
            resident(w1.shape), resident(b1.shape),               # fc1 (resident)
            resident(w2.shape), resident(b2.shape),               # fc2 (resident)
            resident(w3_row.shape),                               # fc3 weight row
            pl.BlockSpec(memory_space=pltpu.MemorySpace.SMEM),    # fc3 bias scalar
        ],
        out_specs=pl.BlockSpec((1, tb), lambda i: (i, 0)),        # lane-dense out
        compiler_params=pltpu.CompilerParams(
            dimension_semantics=("parallel",),   # shards batch loop on v7x's 2 TCs
            vmem_limit_bytes=vmem_limit,
        ),
        cost_estimate=cost,
    )(z.astype(jnp.float32), w1, b1, w2, b2, w3_row, b3)

    # Row r of the batch lands at flat index r (tile r // tb, lane r % tb);
    # ragged-tail garbage rows (>= B) are sliced off here.
    return out.reshape(-1)[:B].reshape(B, 1)


def init_params(key, inp, hidden):
    """Deterministic parameter init (shapes follow the nn.Linear layers).

    NOTE: for best MXU/VPU lane utilization `hidden` should be a multiple of
    128 (zero-padding the layer is accuracy-free); the kernel works for any
    hidden, it just under-fills lanes for small values like 32.
    """
    k1, k2, k3, k4, k5, k6 = jax.random.split(key, 6)
    scale1 = 1.0 / jnp.sqrt(inp)
    scale2 = 1.0 / jnp.sqrt(hidden)
    return {
        # stored as (in_features, out_features) == PyTorch weight transposed
        "w1": jax.random.uniform(k1, (inp, hidden), jnp.float32, -scale1, scale1),
        "b1": jax.random.uniform(k2, (1, hidden), jnp.float32, -scale1, scale1),
        "w2": jax.random.uniform(k3, (hidden, hidden), jnp.float32, -scale2, scale2),
        "b2": jax.random.uniform(k4, (1, hidden), jnp.float32, -scale2, scale2),
        "w3": jax.random.uniform(k5, (hidden, 1), jnp.float32, -scale2, scale2),
        "b3": jax.random.uniform(k6, (1, 1), jnp.float32, -scale2, scale2),
    }


def _reference(z, params):
    """Pure-JAX reference with the same mixed precision as the kernel."""
    zb = z.astype(jnp.bfloat16)
    w1 = params["w1"].astype(jnp.bfloat16)
    w2 = params["w2"].astype(jnp.bfloat16)
    h = jnp.maximum(jnp.dot(zb, w1, preferred_element_type=jnp.float32)
                    + params["b1"].reshape(1, -1), 0.0)
    h = jnp.maximum(jnp.dot(h.astype(jnp.bfloat16), w2,
                            preferred_element_type=jnp.float32)
                    + params["b2"].reshape(1, -1), 0.0)
    logits = h @ params["w3"] + params["b3"]
    return jax.nn.sigmoid(logits)


if __name__ == "__main__":
    key = jax.random.PRNGKey(0)
    k_params, k_z, k_z2, k_z3 = jax.random.split(key, 4)

    batch, inp, hidden = 8, 16, 32  # small shapes (hidden_states is a ctor arg)
    params = init_params(k_params, inp, hidden)

    # Small batch (single grid step).
    z = jax.random.normal(k_z, (batch, inp), dtype=jnp.float32)
    out = jax.block_until_ready(discriminator_forward(z, params))
    ref = _reference(z, params)
    assert out.shape == (batch, 1)
    assert jnp.allclose(out, ref, atol=2e-4, rtol=2e-4), "small-batch mismatch"

    # Mid-size batch, not a multiple of the tile: exercises the 2-tile (dual-TC)
    # path with a ragged tail tile and no host-side padding.
    z_mid = jax.random.normal(k_z2, (603, inp), dtype=jnp.float32)
    out_mid = jax.block_until_ready(discriminator_forward(z_mid, params))
    ref_mid = _reference(z_mid, params)
    assert out_mid.shape == (603, 1)
    assert jnp.allclose(out_mid, ref_mid, atol=2e-4, rtol=2e-4), "mid-batch mismatch"
    assert bool(jnp.all(jnp.isfinite(out_mid))), "non-finite values in valid rows"

    # Large batch: capped 1024-row tiles, multi-step grid, resident weights.
    z_big = jax.random.normal(k_z3, (3000, inp), dtype=jnp.float32)
    out_big = jax.block_until_ready(discriminator_forward(z_big, params))
    ref_big = _reference(z_big, params)
    assert out_big.shape == (3000, 1)
    assert jnp.allclose(out_big, ref_big, atol=2e-4, rtol=2e-4), "large-batch mismatch"

    print("KERNEL_OK")
</pallas_src>

<mosaic_0001>
module attributes {stable_mosaic.version = 11 : i64} {
  func.func @_discriminator_kernel(%arg0: i32, %arg1: memref<8x16xf32, #tpu.memory_space<vmem>>, %arg2: memref<16x32xbf16, #tpu.memory_space<vmem>>, %arg3: memref<1x32xf32, #tpu.memory_space<vmem>>, %arg4: memref<32x32xbf16, #tpu.memory_space<vmem>>, %arg5: memref<1x32xf32, #tpu.memory_space<vmem>>, %arg6: memref<1x32xf32, #tpu.memory_space<vmem>>, %arg7: memref<1x1xf32, #tpu.memory_space<smem>>, %arg8: memref<1x8xf32, #tpu.memory_space<vmem>>) attributes {dimension_semantics = [#tpu.dimension_semantics<parallel>], iteration_bounds = array<i64: 1>, scalar_prefetch = 0 : i64, scratch_operands = 0 : i64, tpu.core_type = #tpu.core_type<tc>, window_params = [{transform_indices = @transform_0, window_bounds = array<i64: 8, 16>}, {pipeline_mode = #tpu.pipeline_mode<synchronous>, transform_indices = @transform_1, window_bounds = array<i64: 16, 32>}, {pipeline_mode = #tpu.pipeline_mode<synchronous>, transform_indices = @transform_2, window_bounds = array<i64: 1, 32>}, {pipeline_mode = #tpu.pipeline_mode<synchronous>, transform_indices = @transform_3, window_bounds = array<i64: 32, 32>}, {pipeline_mode = #tpu.pipeline_mode<synchronous>, transform_indices = @transform_4, window_bounds = array<i64: 1, 32>}, {pipeline_mode = #tpu.pipeline_mode<synchronous>, transform_indices = @transform_5, window_bounds = array<i64: 1, 32>}, {transform_indices = @transform_6, window_bounds = array<i64: 1, 1>}, {transform_indices = @transform_7, window_bounds = array<i64: 1, 8>}]} {
    %c0 = arith.constant 0 : index
    %c0_0 = arith.constant 0 : index
    %0 = vector.load %arg1[%c0, %c0_0] : memref<8x16xf32, #tpu.memory_space<vmem>>, vector<8x16xf32>
    %1 = arith.truncf %0 : vector<8x16xf32> to vector<8x16xbf16>
    %c0_1 = arith.constant 0 : index
    %c0_2 = arith.constant 0 : index
    %2 = vector.load %arg2[%c0_1, %c0_2] : memref<16x32xbf16, #tpu.memory_space<vmem>>, vector<16x32xbf16>
    %cst = arith.constant dense<0.000000e+00> : vector<8x32xf32>
    %3 = tpu.matmul %1, %2, %cst {dimension_numbers = #tpu.dot_dimension_numbers<[1], [0], [0], [1], [0, 0, 1, 1], [], []>} : vector<8x16xbf16>, vector<16x32xbf16>, vector<8x32xf32> -> vector<8x32xf32>
    %c0_3 = arith.constant 0 : index
    %c0_4 = arith.constant 0 : index
    %4 = vector.load %arg3[%c0_3, %c0_4] : memref<1x32xf32, #tpu.memory_space<vmem>>, vector<1x32xf32>
    %5 = vector.broadcast %4 : vector<1x32xf32> to vector<8x32xf32>
    %6 = arith.addf %3, %5 : vector<8x32xf32>
    %cst_5 = arith.constant 0.000000e+00 : f32
    %7 = vector.broadcast %cst_5 : f32 to vector<8x32xf32>
    %8 = arith.maximumf %6, %7 : vector<8x32xf32>
    %9 = arith.truncf %8 : vector<8x32xf32> to vector<8x32xbf16>
    %c0_6 = arith.constant 0 : index
    %c0_7 = arith.constant 0 : index
    %10 = vector.load %arg4[%c0_6, %c0_7] : memref<32x32xbf16, #tpu.memory_space<vmem>>, vector<32x32xbf16>
    %cst_8 = arith.constant dense<0.000000e+00> : vector<8x32xf32>
    %11 = tpu.matmul %9, %10, %cst_8 {dimension_numbers = #tpu.dot_dimension_numbers<[1], [0], [0], [1], [0, 0, 1, 1], [], []>} : vector<8x32xbf16>, vector<32x32xbf16>, vector<8x32xf32> -> vector<8x32xf32>
    %c0_9 = arith.constant 0 : index
    %c0_10 = arith.constant 0 : index
    %12 = vector.load %arg5[%c0_9, %c0_10] : memref<1x32xf32, #tpu.memory_space<vmem>>, vector<1x32xf32>
    %13 = vector.broadcast %12 : vector<1x32xf32> to vector<8x32xf32>
    %14 = arith.addf %11, %13 : vector<8x32xf32>
    %cst_11 = arith.constant 0.000000e+00 : f32
    %15 = vector.broadcast %cst_11 : f32 to vector<8x32xf32>
    %16 = arith.maximumf %14, %15 : vector<8x32xf32>
    %c0_12 = arith.constant 0 : index
    %c0_13 = arith.constant 0 : index
    %17 = vector.load %arg6[%c0_12, %c0_13] : memref<1x32xf32, #tpu.memory_space<vmem>>, vector<1x32xf32>
    %18 = vector.broadcast %17 : vector<1x32xf32> to vector<8x32xf32>
    %19 = arith.mulf %16, %18 : vector<8x32xf32>
    %cst_14 = arith.constant dense<0.000000e+00> : vector<8xf32>
    %20 = vector.multi_reduction <add>, %19, %cst_14 [1] : vector<8x32xf32> to vector<8xf32>
    %c0_15 = arith.constant 0 : index
    %c0_16 = arith.constant 0 : index
    %21 = memref.load %arg7[%c0_15, %c0_16] : memref<1x1xf32, #tpu.memory_space<smem>>
    %22 = vector.broadcast %21 : f32 to vector<8xf32>
    %23 = arith.addf %20, %22 : vector<8xf32>
    %24 = arith.negf %23 : vector<8xf32>
    %25 = math.exp %24 : vector<8xf32>
    %cst_17 = arith.constant 1.000000e+00 : f32
    %26 = vector.broadcast %cst_17 : f32 to vector<8xf32>
    %27 = arith.addf %26, %25 : vector<8xf32>
    %28 = arith.divf %26, %27 : vector<8xf32>
    %29 = vector.shape_cast %28 : vector<8xf32> to vector<1x8xf32>
    %c0_18 = arith.constant 0 : index
    %c0_19 = arith.constant 0 : index
    %30 = vector.load %arg8[%c0_18, %c0_19] : memref<1x8xf32, #tpu.memory_space<vmem>>, vector<1x8xf32>
    tpu.vector_store %arg8[%c0_18, %c0_19], %29 {strides = array<i32>} : memref<1x8xf32, #tpu.memory_space<vmem>>, vector<1x8xf32>,
    return
  }
  func.func @transform_0(%arg0: i32) -> (i32, i32) {
    %c0_i32 = arith.constant 0 : i32
    %c0_i32_0 = arith.constant 0 : i32
    return %arg0, %c0_i32 : i32, i32
  }
  func.func @transform_1(%arg0: i32) -> (i32, i32) {
    %c0_i32 = arith.constant 0 : i32
    %c0_i32_0 = arith.constant 0 : i32
    %c0_i32_1 = arith.constant 0 : i32
    return %c0_i32, %c0_i32_0 : i32, i32
  }
  func.func @transform_2(%arg0: i32) -> (i32, i32) {
    %c0_i32 = arith.constant 0 : i32
    %c0_i32_0 = arith.constant 0 : i32
    %c0_i32_1 = arith.constant 0 : i32
    return %c0_i32, %c0_i32_0 : i32, i32
  }
  func.func @transform_3(%arg0: i32) -> (i32, i32) {
    %c0_i32 = arith.constant 0 : i32
    %c0_i32_0 = arith.constant 0 : i32
    %c0_i32_1 = arith.constant 0 : i32
    return %c0_i32, %c0_i32_0 : i32, i32
  }
  func.func @transform_4(%arg0: i32) -> (i32, i32) {
    %c0_i32 = arith.constant 0 : i32
    %c0_i32_0 = arith.constant 0 : i32
    %c0_i32_1 = arith.constant 0 : i32
    return %c0_i32, %c0_i32_0 : i32, i32
  }
  func.func @transform_5(%arg0: i32) -> (i32, i32) {
    %c0_i32 = arith.constant 0 : i32
    %c0_i32_0 = arith.constant 0 : i32
    %c0_i32_1 = arith.constant 0 : i32
    return %c0_i32, %c0_i32_0 : i32, i32
  }
  func.func @transform_6(%arg0: i32) -> (i32, i32) {
    %c0_i32 = arith.constant 0 : i32
    %c0_i32_0 = arith.constant 0 : i32
    %c0_i32_1 = arith.constant 0 : i32
    return %c0_i32, %c0_i32_0 : i32, i32
  }
  func.func @transform_7(%arg0: i32) -> (i32, i32) {
    %c0_i32 = arith.constant 0 : i32
    %c0_i32_0 = arith.constant 0 : i32
    return %arg0, %c0_i32 : i32, i32
  }
}

</mosaic_0001>

<bundles_post_ra>
// kernel: tpu_custom_call.1
= control target key start
LH: loop header
LB: loop body
LE: loop exit
PB: predicated region body
PF: predicated region fallthrough
CT: control target
= control target key end

     0   :  { %13 = vsyncpa [#allocation4], 0  ;;  %s403_s0 = inlined_call_operand.hbm [shape: f32[8,16], index: 0, kind: input, shape index: {}]   ;;  %s404_s1 = inlined_call_operand.hbm [shape: bf16[16,32], index: 1, kind: input, shape index: {}]   ;;  %s405_s2 = inlined_call_operand.vmem [shape: f32[1,32], index: 2, kind: input, shape index: {}]   ;;  %s406_s3 = inlined_call_operand.hbm [shape: bf16[32,32], index: 3, kind: input, shape index: {}]   ;;  %s407_s4 = inlined_call_operand.vmem [shape: f32[1,32], index: 4, kind: input, shape index: {}]   ;;  %s408_s5 = inlined_call_operand.vmem [shape: f32[1,32], index: 5, kind: input, shape index: {}]   ;;  %s409_s6 = inlined_call_operand.<no memory space> [shape: f32[1,1], index: 6, kind: input, shape index: {}]   ;;  %s410_s7 = inlined_call_operand.hbm [shape: f32[1,8], index: 7, kind: output, shape index: {}]  }
   0x1   :  { %14 = vsyncpa [#allocation7], 0  ;;  %s31_s26 = sshll.u32 %s404_s1, 4  ;;  %s32_s26 = int_to_ptr.hbm [resolvable:$true] %s31_s26 }
   0x2   :  { %15 = vsyncpa [#allocation5], 0  ;;  %s333_s27 = smov [#allocation6]   ;;  %s21_s8 = sshll.u32 %s403_s0, 4  ;;  %s22_s8 = int_to_ptr.hbm [resolvable:$true] %s21_s8 }
   0x3   :  { %s33_s28 = sshll.u32 %s333_s27, 4  ;;  %s334_s9 = smov 64   ;;  %s34_s28 = int_to_ptr.vmem [resolvable:$true] %s33_s28 }
   0x4   :  { %s335_s10 = smov 4   ;;  %s336_s11 = smov [#allocation3]  }
   0x5   :  { %39 = dma.hbm_to_vmem [thread:$0]  %s32_s26, 128, %s34_s28, [#allocation7], %s334_s9, %s334_s9, %s335_s10  }
   0x6   :  { %s23_s12 = sshll.u32 %s336_s11, 4  ;;  %s46_s15 = sshll.u32 %s406_s3, 4  ;;  %s24_s12 = int_to_ptr.vmem [resolvable:$true] %s23_s12  ;;  %s47_s15 = int_to_ptr.hbm [resolvable:$true] %s46_s15 }
   0x7   :  { %26 = dma.hbm_to_vmem [thread:$0]  %s22_s8, 128, %s24_s12, [#allocation4]  }
   0x8   :  { %s337_s1 = smov [#allocation8]  }
   0x9   :  { %s48_s16 = sshll.u32 %s337_s1, 4  ;;  %s49_s16 = int_to_ptr.vmem [resolvable:$true] %s48_s16 }
   0xa   :  { %54 = dma.hbm_to_vmem [thread:$0]  %s47_s15, 256, %s49_s16, [#allocation7], %s334_s9, %s334_s9, %s335_s10  }
   0xb   :  { %327 = dma.done.wait [#allocation4], 128  }
   0xc   :  { %328 = vsyncadd [#allocation4], 4294967168 }
   0xd   :  { %329 = dma.done.wait [#allocation7], 384  }
   0xe   :  { %330 = vsyncadd [#allocation7], 4294966912  ;;  %v215_v0 = vld [vmem:[#allocation6] sm:$0xff]  ;;  %v74_v1 = vld [vmem:[#allocation3] sm:$0xff]  ;;  %vm88_vm0 = vcmask 130048   ;;  %vm127_vm1 = vcmask 261120   ;;  %v154_v19 = vstv %s409_s6  ;;  %v176_v28 = vlaneseq }
   0xf   :  { %v75_v2 = vpack.c.bf16 %v74_v1, %v74_v1  ;;  %99 = vmatpush.bf16.msra.mxu0 %v215_v0  ;;  %v217_v3 = vld [vmem:[#allocation8 + $0x8] sm:$0xff]  ;;  %v216_v4 = vld [vmem:[#allocation8] sm:$0xff]  ;;  %v224_v5 = vld [vmem:[%s405_s2] ss:$0 sm:$0xff]  ;;  %s189_s23 = sshll.u32 %s410_s7, 4  ;;  %vm180_vm6 = vcmask 57344   ;;  %s190_s23 = int_to_ptr.hbm [resolvable:$true] %s189_s23 }
  0x10   :  { %137 = vmatpush.bf16.msra.mxu1 %v217_v3  ;;  %v225_v11 = vld [vmem:[%s407_s4] ss:$0 sm:$0xff]  ;;  %v177_v33 = vand.u32 127, %v176_v28  ;;  %s338_s4 = smov [#allocation9]  }
  0x11   :  { %v226_v14 = vld [vmem:[%s408_s5] ss:$0 sm:$0xff]  ;;  %s187_s5 = sshll.u32 %s338_s4, 4  ;;  %s188_s5 = int_to_ptr.vmem [resolvable:$true] %s187_s5 }
  0x12   :  { %204 = vmatmul.msk.bf16.vlgmr.msra.gmra.mxu0 %vm88_vm0, %v75_v2 }
  0x14   :  { %138 = vmatpush.bf16.msra.mxu1 %v216_v4 }
  0x8f   :  { %v101_v6 = vpop.f32.mrf.mxu0 }
  0x90   :  { %v102_v7 = vadd.f32 %v224_v5, %v101_v6 }
  0x92   :  { %v105_v8 = vmax.f32 %v102_v7, 0.0 }
  0x94   :  { %v106_v9 = vpack.c.bf16 %v105_v8, %v105_v8 }
  0x96   :  { %213 = vmatmul.msk.bf16.vlgmr.msra.gmra.mxu1 %vm127_vm1, %v106_v9 }
  0x97   :  { %v103_v10 = vpop.f32.mrf.mxu0 }
 0x113   :  { %v140_v12 = vpop.f32.mrf.mxu1 }
 0x114   :  { %v141_v13 = vadd.f32 %v225_v11, %v140_v12 }
 0x116   :  { %v144_v15 = vmax.f32 %v141_v13, 0.0 }
 0x118   :  { %v149_v16 = vmul.f32 %v226_v14, %v144_v15 }
 0x11a   :  { %v150_v17 = vsel %vm127_vm1, %v149_v16, 0.0 }
 0x11b   :  { %v142_v18 = vpop.f32.mrf.mxu1  ;;  %151 = vadd.xlane.f32.xlu0 %v150_v17 }
 0x18e   :  { %v152_v20 = vpop.xlane.xlu0 %151 }
 0x18f   :  { %v155_v21 = vadd.f32 %v154_v19, %v152_v20 }
 0x191   :  { %v214_v22 = vmul.f32 -1.442695, %v155_v21 }
 0x193   :  { %227 = vpow2.f32 %v214_v22 }
 0x199   :  { %v228_v23 = vpop.eup %227 }
 0x19a   :  { %v159_v24 = vadd.f32 1.0, %v228_v23 }
 0x19c   :  { %229 = vrcp.f32 %v159_v24  ;;  %v171_v29 = vand.u32 2147483648, %v159_v24  ;;  %v169_v31 = vand.u32 2147483647, %v159_v24  ;;  %vm165_vm3 = vweird.f32 %v159_v24 }
 0x19e   :  { %v172_v34 = vor.u32 1.1754944e-38, %v171_v29  ;;  %vm170_vm5 = vcmp.eq.f32.partialorder %v169_v31, 8.507059e+37 }
 0x1a2   :  { %v230_v25 = vpop.eup %229 }
 0x1a3   :  { %v161_v26 = vmul.f32 %v230_v25, %v159_v24  ;;  %vm166_vm2 = vweird.f32 %v230_v25 }
 0x1a4   :  { %vm167_vm4 = vmor %vm165_vm3, %vm166_vm2 }
 0x1a5   :  { %v162_v27 = vsub.f32 1.0, %v161_v26 }
 0x1a7   :  { %v163_v30 = vmul.f32 %v230_v25, %v162_v27 }
 0x1a9   :  { %v164_v32 = vadd.f32 %v230_v25, %v163_v30 }
 0x1ab   :  { %v168_v35 = vsel %vm167_vm4, %v230_v25, %v164_v32 }
 0x1ac   :  { %v173_v36 = vsel %vm170_vm5, %v172_v34, %v168_v35 }
 0x1ad   :  { %v178_v37 = vperm.slane %v173_v36, %v177_v33 }
 0x1af   :  { %181 = vst.msk [vmem:[#allocation9] sm:$0x1] %vm180_vm6, %v178_v37 }
 0x1b0   :  { %192 = dma.vmem_to_hbm [thread:$0]  %s188_s5, 16, %s190_s23, [#allocation5]  }
 0x1b1   :  { %331 = dma.done.wait [#allocation5], 16  }
 0x1b2   :  { %332 = vsyncadd [#allocation5], 4294967280 }
 0x1b3   :  { %197 = vsyncpa [#allocation4], 1 }
 0x1b4   :  { %198 = vsyncpa [#allocation7], 1 }
 0x1b5   :  { %199 = vsyncpa [#allocation5], 1 }

</bundles_post_ra>
